<compile_context>
chip_gen: v7x
topology: tpu7x:2x2x1
jax: 0.10.0
libtpu: 0.0.40
codegen_flags: <defaults>
</compile_context>

<pallas_src>
import jax
import jax.numpy as jnp
from jax import lax
from jax.experimental import pallas as pl
from jax.experimental.pallas import tpu as pltpu


# ---------------------------------------------------------------------------
# Kernel
# ---------------------------------------------------------------------------
def _lm_criterion_kernel(pred_ref, tgt_ref, msk_ref, loss_ref):
    """Grid = (core, row_step, vocab_chunk).  loss_ref: per-core resident acc."""
    j = pl.program_id(1)
    k = pl.program_id(2)

    @pl.when((j == 0) & (k == 0))
    def _():
        loss_ref[...] = jnp.zeros_like(loss_ref)

    pred = pred_ref[...]                      # (RT, CT) input dtype (f32 / bf16)
    tgt = tgt_ref[...]                        # (RT, 1) int32 (padded rows = -1)
    msk = msk_ref[...]                        # (RT, 1) float32 (padded rows = 0)

    ct = pred.shape[-1]
    base = k * ct                             # column offset of this vocab chunk
    col_ids = base + lax.broadcasted_iota(jnp.int32, (1, ct), 1)
    onehot = col_ids == tgt                   # (RT, CT); all-False for pad rows
    # gather(pred, 1, target) via one-hot select + lane reduction, kept in the
    # input dtype (exact: all non-selected addends are exactly 0.0).
    picked = jnp.sum(jnp.where(onehot, pred, jnp.zeros_like(pred)),
                     axis=-1, keepdims=True).astype(jnp.float32)   # (RT, 1)

    loss_ref[...] += picked * msk


# ---------------------------------------------------------------------------
# Hardware / tiling helpers
# ---------------------------------------------------------------------------
def _num_tensorcores():
    """2 on v7x / megacore chips, 1 on v5e / v6e; correctness never depends on it."""
    try:
        kind = jax.devices()[0].device_kind.lower()
    except Exception:
        return 1
    if "v7" in kind:
        return 2
    if "lite" in kind or "v5e" in kind or "v6e" in kind or "v6" in kind:
        return 1
    if "v4" in kind or "v5p" in kind or "v5" in kind:
        return 2           # megacore pair
    return 1


def _vmem_capacity_bytes(num_cores):
    try:
        cap = int(pltpu.get_tpu_info().vmem_capacity_bytes)
    except Exception:
        cap = 64 * 1024 * 1024
    if num_cores >= 2:
        # v7x has 64 MiB per TensorCore; be conservative in case the query is
        # per-chip rather than per-TC.
        cap = min(cap, 64 * 1024 * 1024)
    return cap


def _pick_tiles(N, V, itemsize, num_cores, vmem_bytes):
    # Vocab tile: full V when small (block last dim == array dim is always
    # legal), otherwise a 128-aligned chunk to bound in-kernel temporaries.
    col_tile = V if V <= 2048 else 1024
    k_chunks = pl.cdiv(V, col_tile)

    budget = int(vmem_bytes * 0.55)           # headroom for compiler internals
    # per-row VMEM cost: double-buffered pred chunk + ~3 chunk-wide f32-width
    # temporaries (iota / compare / select) + lane-padded (RT,1) arrays.
    per_row = 2 * col_tile * itemsize + 3 * col_tile * 4 + 6 * 128 * 4
    rt = budget // per_row
    rt = max(8, min((rt // 8) * 8, 2048))
    rows_per_core = pl.cdiv(N, num_cores)
    rt = min(rt, max(8, ((rows_per_core + 7) // 8) * 8))
    return int(rt), int(col_tile), int(k_chunks)


# ---------------------------------------------------------------------------
# Wrapper (matches LanguageModelCriterion.forward semantics)
# ---------------------------------------------------------------------------
def language_model_criterion(pred, target, mask, eos_idx, *,
                             row_tile=None, col_tile=None, num_cores=None):
    """pred: (B,T,V) log-probs (f32 or bf16); target: (B,T) int; mask: (B,T)."""
    B, T, V = pred.shape
    N = B * T

    # glue: target shift (torch.cat([target[:, 1:], eos column], dim=1))
    target = jnp.concatenate(
        [target[:, 1:], jnp.full((B, 1), eos_idx, dtype=target.dtype)], axis=1)

    pred_flat = pred.reshape(N, V)                        # keep incoming dtype
    tgt_flat = target.reshape(N, 1).astype(jnp.int32)
    mask_flat = mask.reshape(N, 1).astype(jnp.float32)
    mask_sum = jnp.sum(mask_flat)                         # denominator (wrapper side)

    C = num_cores if num_cores is not None else _num_tensorcores()
    if N < 8 * C:
        C = 1

    cap = _vmem_capacity_bytes(C)
    auto_rt, auto_ct, _ = _pick_tiles(N, V, pred_flat.dtype.itemsize, C, cap)
    rt = int(row_tile) if row_tile else auto_rt
    ct = int(col_tile) if col_tile else auto_ct
    k_chunks = pl.cdiv(V, ct)

    steps = pl.cdiv(N, C * rt)
    rows_padded = C * steps * rt
    if rows_padded != N:
        extra = rows_padded - N
        # Pad ONLY the tiny per-row arrays.  Padded targets use -1 so the
        # one-hot compare is all-False -> exact 0.0, independent of whatever
        # the (clamped / ragged) pred block holds.  pred is never copied.
        tgt_flat = jnp.concatenate(
            [tgt_flat, jnp.full((extra, 1), -1, dtype=jnp.int32)], axis=0)
        mask_flat = jnp.concatenate(
            [mask_flat, jnp.zeros((extra, 1), dtype=jnp.float32)], axis=0)

    max_blk = pl.cdiv(N, rt) - 1       # last valid pred row-block (may be ragged)

    loss_part = pl.pallas_call(
        _lm_criterion_kernel,
        out_shape=jax.ShapeDtypeStruct((C * rt, 1), jnp.float32),
        grid_spec=pltpu.PrefetchScalarGridSpec(
            num_scalar_prefetch=0,
            grid=(C, steps, k_chunks),
            in_specs=[
                # pred row-block index clamped to the last real block; fully
                # padded grid steps just re-see real data (zeroed by the -1
                # targets), so no fully-out-of-bounds block is ever requested.
                pl.BlockSpec((rt, ct),
                             lambda c, j, k: (jnp.minimum(c * steps + j, max_blk), k)),
                pl.BlockSpec((rt, 1), lambda c, j, k: (c * steps + j, 0)),
                pl.BlockSpec((rt, 1), lambda c, j, k: (c * steps + j, 0)),
            ],
            out_specs=pl.BlockSpec((rt, 1), lambda c, j, k: (c, 0)),
        ),
        compiler_params=pltpu.CompilerParams(
            dimension_semantics=("parallel", "arbitrary", "arbitrary"),
            vmem_limit_bytes=int(cap * 0.9),
        ),
        cost_estimate=pl.CostEstimate(
            flops=3 * N * V,
            transcendentals=0,
            bytes_accessed=N * V * pred_flat.dtype.itemsize + N * 8 + C * rt * 4,
        ),
    )(pred_flat, tgt_flat, mask_flat)

    # epilogue: negate once, reduce, divide (NaN if sum(mask)==0, same as torch).
    return (-jnp.sum(loss_part) / mask_sum).astype(jnp.float32)


# ---------------------------------------------------------------------------
# Pure-JAX reference
# ---------------------------------------------------------------------------
def _reference(pred, target, mask, eos_idx):
    B, T, V = pred.shape
    target = jnp.concatenate(
        [target[:, 1:], jnp.full((B, 1), eos_idx, dtype=target.dtype)], axis=1)
    pred_flat = pred.reshape(-1, V)
    tgt_flat = target.reshape(-1)
    mask_flat = mask.reshape(-1).astype(jnp.float32)
    picked = jnp.take_along_axis(pred_flat, tgt_flat[:, None], axis=1)[:, 0]
    out = -1.0 * picked.astype(jnp.float32) * mask_flat
    return (jnp.sum(out) / jnp.sum(mask_flat)).astype(jnp.float32)


if __name__ == "__main__":
    key = jax.random.PRNGKey(0)
    eos_idx = 0

    # ----- test 1: small, block-aligned, f32 and bf16 streams -----
    B, T, V = 2, 8, 32
    k1, k2, k3 = jax.random.split(key, 3)
    logits = jax.random.normal(k1, (B, T, V), dtype=jnp.float32)
    pred = jax.nn.log_softmax(logits, axis=-1)
    target = jax.random.randint(k2, (B, T), 0, V, dtype=jnp.int32)
    lens = jnp.array([6, 4])
    mask = (jnp.arange(T)[None, :] < lens[:, None]).astype(jnp.float32)

    out = jax.block_until_ready(
        language_model_criterion(pred, target, mask, eos_idx))
    ref = _reference(pred, target, mask, eos_idx)
    assert jnp.allclose(out, ref, atol=1e-5, rtol=1e-5), (out, ref)

    pred_bf16 = pred.astype(jnp.bfloat16)
    out_bf = jax.block_until_ready(
        language_model_criterion(pred_bf16, target, mask, eos_idx))
    ref_bf = _reference(pred_bf16, target, mask, eos_idx)
    assert jnp.allclose(out_bf, ref_bf, atol=1e-4, rtol=1e-4), (out_bf, ref_bf)

    # ----- test 2: ragged rows + vocab chunking (partial blocks, no pred pad) -----
    B2, T2, V2 = 2, 10, 200
    k4, k5 = jax.random.split(k3)
    logits2 = jax.random.normal(k4, (B2, T2, V2), dtype=jnp.float32)
    pred2 = jax.nn.log_softmax(logits2, axis=-1)
    target2 = jax.random.randint(k5, (B2, T2), 0, V2, dtype=jnp.int32)
    lens2 = jnp.array([7, 10])
    mask2 = (jnp.arange(T2)[None, :] < lens2[:, None]).astype(jnp.float32)

    out2 = jax.block_until_ready(
        language_model_criterion(pred2, target2, mask2, eos_idx,
                                 row_tile=8, col_tile=128, num_cores=1))
    ref2 = _reference(pred2, target2, mask2, eos_idx)
    assert jnp.allclose(out2, ref2, atol=1e-5, rtol=1e-5), (out2, ref2)

    # ----- test 3: explicit 2-core split (exercises clamped pred blocks) -----
    out3 = jax.block_until_ready(
        language_model_criterion(pred2, target2, mask2, eos_idx,
                                 row_tile=8, col_tile=128, num_cores=2))
    assert jnp.allclose(out3, ref2, atol=1e-5, rtol=1e-5), (out3, ref2)

    print("KERNEL_OK")
</pallas_src>

<mosaic_0001>
module attributes {stable_mosaic.version = 11 : i64} {
  func.func @_lm_criterion_kernel(%arg0: i32, %arg1: i32, %arg2: i32, %arg3: memref<16x32xf32, #tpu.memory_space<vmem>>, %arg4: memref<16x1xi32, #tpu.memory_space<vmem>>, %arg5: memref<16x1xf32, #tpu.memory_space<vmem>>, %arg6: memref<16x1xf32, #tpu.memory_space<vmem>>) attributes {dimension_semantics = [#tpu.dimension_semantics<parallel>, #tpu.dimension_semantics<arbitrary>, #tpu.dimension_semantics<arbitrary>], iteration_bounds = array<i64: 1, 1, 1>, scalar_prefetch = 0 : i64, scratch_operands = 0 : i64, tpu.core_type = #tpu.core_type<tc>, window_params = [{transform_indices = @transform_0, window_bounds = array<i64: 16, 32>}, {transform_indices = @transform_1, window_bounds = array<i64: 16, 1>}, {transform_indices = @transform_2, window_bounds = array<i64: 16, 1>}, {transform_indices = @transform_3, window_bounds = array<i64: 16, 1>}]} {
    %c0_i32 = arith.constant 0 : i32
    %0 = arith.cmpi eq, %arg1, %c0_i32 : i32
    %c0_i32_0 = arith.constant 0 : i32
    %1 = arith.cmpi eq, %arg2, %c0_i32_0 : i32
    %2 = arith.andi %0, %1 : i1
    %3 = arith.extui %2 : i1 to i32
    %c0_i32_1 = arith.constant 0 : i32
    %4 = arith.cmpi ne, %3, %c0_i32_1 : i32
    scf.if %4 {
      %cst_12 = arith.constant 0.000000e+00 : f32
      %23 = vector.broadcast %cst_12 : f32 to vector<16x1xf32>
      %c0_13 = arith.constant 0 : index
      %c0_14 = arith.constant 0 : index
      %24 = vector.load %arg6[%c0_13, %c0_14] : memref<16x1xf32, #tpu.memory_space<vmem>>, vector<16x1xf32>
      tpu.vector_store %arg6[%c0_13, %c0_14], %23 {strides = array<i32>} : memref<16x1xf32, #tpu.memory_space<vmem>>, vector<16x1xf32>,
    } else {
    }
    %c0 = arith.constant 0 : index
    %c0_2 = arith.constant 0 : index
    %5 = vector.load %arg3[%c0, %c0_2] : memref<16x32xf32, #tpu.memory_space<vmem>>, vector<16x32xf32>
    %c0_3 = arith.constant 0 : index
    %c0_4 = arith.constant 0 : index
    %6 = vector.load %arg4[%c0_3, %c0_4] : memref<16x1xi32, #tpu.memory_space<vmem>>, vector<16x1xi32>
    %c0_5 = arith.constant 0 : index
    %c0_6 = arith.constant 0 : index
    %7 = vector.load %arg5[%c0_5, %c0_6] : memref<16x1xf32, #tpu.memory_space<vmem>>, vector<16x1xf32>
    %c32_i32 = arith.constant 32 : i32
    %8 = arith.muli %arg2, %c32_i32 : i32
    %9 = tpu.iota {dimensions = array<i32: 1>} : vector<1x32xi32>
    %10 = vector.broadcast %8 : i32 to vector<1x32xi32>
    %11 = arith.addi %10, %9 : vector<1x32xi32>
    %12 = vector.broadcast %11 : vector<1x32xi32> to vector<16x32xi32>
    %13 = vector.broadcast %6 : vector<16x1xi32> to vector<16x32xi32>
    %14 = arith.cmpi eq, %12, %13 : vector<16x32xi32>
    %cst = arith.constant 0.000000e+00 : f32
    %15 = vector.broadcast %cst : f32 to vector<16x32xf32>
    %16 = arith.select %14, %5, %15 : vector<16x32xi1>, vector<16x32xf32>
    %cst_7 = arith.constant dense<0.000000e+00> : vector<16xf32>
    %17 = vector.multi_reduction <add>, %16, %cst_7 [1] : vector<16x32xf32> to vector<16xf32>
    %18 = vector.shape_cast %17 : vector<16xf32> to vector<16x1xf32>
    %c0_8 = arith.constant 0 : index
    %c0_9 = arith.constant 0 : index
    %19 = vector.load %arg6[%c0_8, %c0_9] : memref<16x1xf32, #tpu.memory_space<vmem>>, vector<16x1xf32>
    %20 = arith.mulf %18, %7 : vector<16x1xf32>
    %21 = arith.addf %19, %20 : vector<16x1xf32>
    %c0_10 = arith.constant 0 : index
    %c0_11 = arith.constant 0 : index
    %22 = vector.load %arg6[%c0_10, %c0_11] : memref<16x1xf32, #tpu.memory_space<vmem>>, vector<16x1xf32>
    tpu.vector_store %arg6[%c0_10, %c0_11], %21 {strides = array<i32>} : memref<16x1xf32, #tpu.memory_space<vmem>>, vector<16x1xf32>,
    return
  }
  func.func @transform_0(%arg0: i32, %arg1: i32, %arg2: i32) -> (i32, i32) {
    %c1_i32 = arith.constant 1 : i32
    %0 = arith.muli %arg0, %c1_i32 : i32
    %1 = arith.addi %0, %arg1 : i32
    %c0_i32 = arith.constant 0 : i32
    %2 = arith.minsi %1, %c0_i32 : i32
    %c0_i32_0 = arith.constant 0 : i32
    return %2, %arg2 : i32, i32
  }
  func.func @transform_1(%arg0: i32, %arg1: i32, %arg2: i32) -> (i32, i32) {
    %c1_i32 = arith.constant 1 : i32
    %0 = arith.muli %arg0, %c1_i32 : i32
    %1 = arith.addi %0, %arg1 : i32
    %c0_i32 = arith.constant 0 : i32
    %c0_i32_0 = arith.constant 0 : i32
    return %1, %c0_i32 : i32, i32
  }
  func.func @transform_2(%arg0: i32, %arg1: i32, %arg2: i32) -> (i32, i32) {
    %c1_i32 = arith.constant 1 : i32
    %0 = arith.muli %arg0, %c1_i32 : i32
    %1 = arith.addi %0, %arg1 : i32
    %c0_i32 = arith.constant 0 : i32
    %c0_i32_0 = arith.constant 0 : i32
    return %1, %c0_i32 : i32, i32
  }
  func.func @transform_3(%arg0: i32, %arg1: i32, %arg2: i32) -> (i32, i32) {
    %c0_i32 = arith.constant 0 : i32
    %c0_i32_0 = arith.constant 0 : i32
    return %arg0, %c0_i32 : i32, i32
  }
}

</mosaic_0001>

<bundles_post_ra>
// kernel: tpu_custom_call.1
= control target key start
LH: loop header
LB: loop body
LE: loop exit
PB: predicated region body
PF: predicated region fallthrough
CT: control target
= control target key end

     0   :  { %v161_v0 = vmov 0   ;;  %vm96_vm0 = vcmask 7168   ;;  %v162_v3 = vmov 0.0   ;;  %v106_v4 = vlaneseq  ;;  %s223_s1 = inlined_call_operand.vmem [shape: s32[16,1], index: 1, kind: input, shape index: {}]   ;;  %s224_s3 = inlined_call_operand.vmem [shape: f32[16,1], index: 3, kind: output, shape index: {}]   ;;  %s225_s0 = inlined_call_operand.vmem [shape: f32[16,32], index: 0, kind: input, shape index: {}]   ;;  %s226_s2 = inlined_call_operand.vmem [shape: f32[16,1], index: 2, kind: input, shape index: {}]  }
   0x1   :  { %160 = vset.pattern.permute.xlu0 %v161_v0  ;;  %v101_v1 = vld [vmem:[%s223_s1] sm:$0xff]  ;;  %v102_v2 = vld [vmem:[%s223_s1 + $0x8] sm:$0xff]  ;;  %97 = vst.msk [vmem:[%s224_s3] sm:$0xff] %vm96_vm0, %v162_v3  ;;  %98 = vst.msk [vmem:[%s224_s3 + $0x8] sm:$0xff] %vm96_vm0, %v162_v3  ;;  %vm120_vm1 = vcmask 261120  }
   0x2   :  { %111 = vperm.xlu0 %160, %v101_v1   ;;  %v107_v5 = vand.u32 127, %v106_v4  ;;  %v99_v6 = vld [vmem:[%s225_s0] sm:$0xff]  ;;  %v100_v10 = vld [vmem:[%s225_s0 + $0x8] sm:$0xff] }
   0x3   :  { %v103_v14 = vld [vmem:[%s226_s2] sm:$0xff]  ;;  %v104_v18 = vld [vmem:[%s226_s2 + $0x8] sm:$0xff] }
   0x6   :  { %114 = vperm.xlu0 %160, %v102_v2  }
   0x8   :  { %v127_v15 = vld [vmem:[%s224_s3] sm:$0xff]  ;;  %v128_v20 = vld [vmem:[%s224_s3 + $0x8] sm:$0xff] }
  0x81   :  { %v112_v7 = vpop.permute.xlu0 %111 }
  0x82   :  { %vm116_vm2 = vcmp.eq.s32.totalorder %v107_v5, %v112_v7 }
  0x83   :  { %v118_v8 = vsel %vm116_vm2, %v99_v6, 0.0 }
  0x84   :  { %v121_v9 = vsel %vm120_vm1, %v118_v8, 0.0 }
  0x85   :  { %v115_v11 = vpop.permute.xlu0 %114  ;;  %122 = vadd.xlane.f32.xlu1 %v121_v9 }
  0x86   :  { %vm117_vm3 = vcmp.eq.s32.totalorder %v107_v5, %v115_v11 }
  0x87   :  { %v119_v12 = vsel %vm117_vm3, %v100_v10, 0.0 }
  0x88   :  { %v124_v13 = vsel %vm120_vm1, %v119_v12, 0.0 }
  0x89   :  { %125 = vadd.xlane.f32.xlu1 %v124_v13 }
 0x112   :  { %v123_v16 = vpop.xlane.xlu1 %122 }
 0x113   :  { %v129_v17 = vmul.f32 %v123_v16, %v103_v14 }
 0x115   :  { %v131_v19 = vadd.f32 %v129_v17, %v127_v15 }
 0x116   :  { %v126_v21 = vpop.xlane.xlu1 %125 }
 0x117   :  { %134 = vst.msk [vmem:[%s224_s3] sm:$0xff] %vm96_vm0, %v131_v19  ;;  %v130_v22 = vmul.f32 %v126_v21, %v104_v18 }
 0x119   :  { %v132_v23 = vadd.f32 %v130_v22, %v128_v20 }
 0x11b   :  { %135 = vst.msk [vmem:[%s224_s3 + $0x8] sm:$0xff] %vm96_vm0, %v132_v23 }

</bundles_post_ra>
